<compile_context>
chip_gen: v5e
topology: v5e:2x2
jax: 0.10.0
libtpu: 0.0.40
codegen_flags: <defaults>
</compile_context>

<pallas_src>
import jax
import jax.numpy as jnp
from jax.experimental import pallas as pl
from jax.experimental.pallas import tpu as pltpu

EPS = 1e-5  # matches the hard-coded eps in the PyTorch forward


def _frozen_bn_kernel(scale_ref, shift_ref, x_ref, out_ref):
    """scale_ref/shift_ref: (tr, 1) per-row (== per-(b,c)) f32 affine params.
    x_ref/out_ref: (tr, t_hw) tile of the flattened (B*C, H*W) tensor.
    The (tr, 1) params broadcast over the lane axis on the VPU; a single fused
    multiply-add per element is written straight to the lane-dense output."""
    out_ref[...] = (x_ref[...] * scale_ref[...] + shift_ref[...]).astype(out_ref.dtype)


def _cdiv(a, b):
    return -(-a // b)


def _vmem_budget():
    """Returns (max bytes per data block, vmem_limit_bytes) for this chip."""
    try:
        vmem = int(pltpu.get_tpu_info().vmem_capacity_bytes)
    except Exception:
        vmem = 64 << 20  # v7x per-TC VMEM — smallest in the fleet; safe default
    # in + out data blocks are double-buffered => ~4x one block, plus tiny
    # padded param blocks.  Cap at 8 MiB (v5e/v6e), ~4 MiB on v7x.
    max_block_bytes = max(1 << 20, min(vmem // 16, 8 << 20))
    # Raise the scoped-VMEM limit so v5e's 16 MiB default doesn't shrink tiles.
    vmem_limit_bytes = int(min(vmem // 2, 64 << 20))
    return max_block_bytes, vmem_limit_bytes


def _choose_tiles(n_rows, hw, elem_bytes, max_block_bytes, row_align, min_steps=8):
    """Pick (row_tile, hw_tile) for the (n_rows, hw) flattened view.

    The HW tile is the full extent when affordable (lane-dense, no tail) or
    the largest multiple of 128 within the byte budget (masked tail block via
    cdiv — no divisibility requirement).  The row tile is a multiple of the
    sublane alignment (or the full extent).  Tiles are then shrunk, when
    possible, until there are >= min_steps grid steps so the pipeline
    double-buffers and both v7x TensorCores get work."""
    # Lane (last) dim.
    if hw <= 128 or row_align * hw * elem_bytes <= max_block_bytes:
        t_hw = hw
    else:
        t_hw = max(128, (max_block_bytes // (row_align * elem_bytes)) // 128 * 128)

    # Sublane (second-to-last) dim.
    if n_rows <= row_align:
        tr = n_rows
    else:
        budget_rows = max(
            row_align,
            (max_block_bytes // (t_hw * elem_bytes)) // row_align * row_align)
        tr = n_rows if budget_rows >= n_rows else budget_rows

    def steps(tr_, thw_):
        return _cdiv(n_rows, tr_) * _cdiv(hw, thw_)

    # Best-effort minimum step count: shrink rows first, then the lane tile.
    while steps(tr, t_hw) < min_steps and tr > row_align:
        tr = max(row_align, (tr // 2) // row_align * row_align)
    while steps(tr, t_hw) < min_steps and t_hw > 128:
        t_hw = max(128, (t_hw // 2) // 128 * 128)
    return tr, t_hw


def frozen_batch_norm_2d(x, weight, bias, running_mean, running_var):
    """x: (B, C, H, W).  weight/bias/running_mean/running_var: (C,).
    Returns x * scale + shift with frozen (buffer) statistics, like PyTorch."""
    B, C, H, W = x.shape
    HW = H * W
    n_rows = B * C

    # Per-channel affine precomputed once in the wrapper (O(C), outside the
    # hot loop), then broadcast to one value per (b, c) row — O(B*C), free.
    scale = weight.astype(jnp.float32) * jax.lax.rsqrt(
        running_var.astype(jnp.float32) + EPS)
    shift = bias.astype(jnp.float32) - running_mean.astype(jnp.float32) * scale
    scale_rows = jnp.tile(scale, B).reshape(n_rows, 1)
    shift_rows = jnp.tile(shift, B).reshape(n_rows, 1)

    # Free layout plumbing: contiguous reshape keeps NCHW element order and
    # puts the (lane-dense) H*W axis last.
    x_flat = x.reshape(n_rows, HW)

    elem_bytes = x.dtype.itemsize
    row_align = max(8, 32 // max(elem_bytes, 1))   # 8 f32, 16 bf16, 32 int8
    max_block_bytes, vmem_limit_bytes = _vmem_budget()
    tr, t_hw = _choose_tiles(n_rows, HW, elem_bytes, max_block_bytes, row_align)
    grid = (_cdiv(n_rows, tr), _cdiv(HW, t_hw))

    data_spec = pl.BlockSpec((tr, t_hw), lambda i, j: (i, j))
    param_spec = pl.BlockSpec((tr, 1), lambda i, j: (i, 0))

    cost = pl.CostEstimate(
        flops=2 * n_rows * HW,                                    # mul + add / elem
        transcendentals=0,                                        # rsqrt in wrapper
        bytes_accessed=2 * n_rows * HW * elem_bytes + 2 * n_rows * 4,
    )

    out_flat = pl.pallas_call(
        _frozen_bn_kernel,
        out_shape=jax.ShapeDtypeStruct((n_rows, HW), x.dtype),
        grid=grid,
        in_specs=[param_spec, param_spec, data_spec],
        out_specs=data_spec,
        compiler_params=pltpu.CompilerParams(
            dimension_semantics=("parallel", "parallel"),
            vmem_limit_bytes=vmem_limit_bytes,
        ),
        cost_estimate=cost,
    )(scale_rows, shift_rows, x_flat)

    return out_flat.reshape(B, C, H, W)


def _reference(x, weight, bias, running_mean, running_var):
    """Pure-JAX reference mirroring the PyTorch forward exactly."""
    scale = weight * jax.lax.rsqrt(running_var + EPS)
    shift = bias - running_mean * scale
    return x * scale[None, :, None, None] + shift[None, :, None, None]


if __name__ == "__main__":
    key = jax.random.PRNGKey(0)
    k_x, k_w, k_b, k_m, k_v = jax.random.split(key, 5)

    # Primary check: the module's nominal small shape.
    B, C, H, W = 2, 4, 16, 16
    x = jax.random.normal(k_x, (B, C, H, W), dtype=jnp.float32)
    # Non-trivial buffer values (module defaults of ones/zeros would make the
    # test vacuous); running_var kept positive like a real variance.
    weight = jax.random.normal(k_w, (C,), dtype=jnp.float32)
    bias = jax.random.normal(k_b, (C,), dtype=jnp.float32)
    running_mean = jax.random.normal(k_m, (C,), dtype=jnp.float32)
    running_var = jax.random.uniform(k_v, (C,), dtype=jnp.float32,
                                     minval=0.5, maxval=1.5)

    out = jax.block_until_ready(
        frozen_batch_norm_2d(x, weight, bias, running_mean, running_var))
    assert out.shape == (B, C, H, W), out.shape
    ref = _reference(x, weight, bias, running_mean, running_var)
    assert jnp.allclose(out, ref, atol=1e-5, rtol=1e-5), \
        "mismatch vs pure-JAX reference (divisible shape)"

    # Secondary check: rows not a multiple of 8 and H*W not a multiple of 128
    # (typical CNN feature-map sizes) exercise the masked tail blocks.
    B2, C2, H2, W2 = 2, 3, 14, 14
    x2 = jax.random.normal(k_x, (B2, C2, H2, W2), dtype=jnp.float32)
    w2 = jax.random.normal(k_w, (C2,), dtype=jnp.float32)
    b2 = jax.random.normal(k_b, (C2,), dtype=jnp.float32)
    m2 = jax.random.normal(k_m, (C2,), dtype=jnp.float32)
    v2 = jax.random.uniform(k_v, (C2,), dtype=jnp.float32, minval=0.5, maxval=1.5)
    out2 = jax.block_until_ready(frozen_batch_norm_2d(x2, w2, b2, m2, v2))
    ref2 = _reference(x2, w2, b2, m2, v2)
    assert jnp.allclose(out2, ref2, atol=1e-5, rtol=1e-5), \
        "mismatch vs pure-JAX reference (non-divisible shape)"

    # TODO(synk): _load_from_state_dict is checkpoint-loading logic with no
    # forward-pass / Pallas equivalent; intentionally omitted.
    print("KERNEL_OK")
</pallas_src>

<mosaic_0001>
module attributes {stable_mosaic.version = 11 : i64} {
  func.func @_frozen_bn_kernel(%arg0: i32, %arg1: i32, %arg2: memref<8x1xf32, #tpu.memory_space<vmem>>, %arg3: memref<8x1xf32, #tpu.memory_space<vmem>>, %arg4: memref<8x128xf32, #tpu.memory_space<vmem>>, %arg5: memref<8x128xf32, #tpu.memory_space<vmem>>) attributes {dimension_semantics = [#tpu.dimension_semantics<parallel>, #tpu.dimension_semantics<parallel>], iteration_bounds = array<i64: 1, 2>, scalar_prefetch = 0 : i64, scratch_operands = 0 : i64, tpu.core_type = #tpu.core_type<tc>, window_params = [{transform_indices = @transform_0, window_bounds = array<i64: 8, 1>}, {transform_indices = @transform_1, window_bounds = array<i64: 8, 1>}, {transform_indices = @transform_2, window_bounds = array<i64: 8, 128>}, {transform_indices = @transform_3, window_bounds = array<i64: 8, 128>}]} {
    %c0 = arith.constant 0 : index
    %c0_0 = arith.constant 0 : index
    %0 = vector.load %arg4[%c0, %c0_0] : memref<8x128xf32, #tpu.memory_space<vmem>>, vector<8x128xf32>
    %c0_1 = arith.constant 0 : index
    %c0_2 = arith.constant 0 : index
    %1 = vector.load %arg2[%c0_1, %c0_2] : memref<8x1xf32, #tpu.memory_space<vmem>>, vector<8x1xf32>
    %2 = vector.broadcast %1 : vector<8x1xf32> to vector<8x128xf32>
    %3 = arith.mulf %0, %2 : vector<8x128xf32>
    %c0_3 = arith.constant 0 : index
    %c0_4 = arith.constant 0 : index
    %4 = vector.load %arg3[%c0_3, %c0_4] : memref<8x1xf32, #tpu.memory_space<vmem>>, vector<8x1xf32>
    %5 = vector.broadcast %4 : vector<8x1xf32> to vector<8x128xf32>
    %6 = arith.addf %3, %5 : vector<8x128xf32>
    %c0_5 = arith.constant 0 : index
    %c0_6 = arith.constant 0 : index
    %7 = vector.load %arg5[%c0_5, %c0_6] : memref<8x128xf32, #tpu.memory_space<vmem>>, vector<8x128xf32>
    tpu.vector_store %arg5[%c0_5, %c0_6], %6 {strides = array<i32>} : memref<8x128xf32, #tpu.memory_space<vmem>>, vector<8x128xf32>,
    return
  }
  func.func @transform_0(%arg0: i32, %arg1: i32) -> (i32, i32) {
    %c0_i32 = arith.constant 0 : i32
    %c0_i32_0 = arith.constant 0 : i32
    return %arg0, %c0_i32 : i32, i32
  }
  func.func @transform_1(%arg0: i32, %arg1: i32) -> (i32, i32) {
    %c0_i32 = arith.constant 0 : i32
    %c0_i32_0 = arith.constant 0 : i32
    return %arg0, %c0_i32 : i32, i32
  }
  func.func @transform_2(%arg0: i32, %arg1: i32) -> (i32, i32) {
    %c0_i32 = arith.constant 0 : i32
    return %arg0, %arg1 : i32, i32
  }
  func.func @transform_3(%arg0: i32, %arg1: i32) -> (i32, i32) {
    %c0_i32 = arith.constant 0 : i32
    return %arg0, %arg1 : i32, i32
  }
}

</mosaic_0001>

<bundles_post_ra>
// kernel: tpu_custom_call.1
= control target key start
LH: loop header
LB: loop body
LE: loop exit
PB: predicated region body
PF: predicated region fallthrough
CT: control target
= control target key end

     0   :  { %8 = vsyncpa [#allocation3], 0  ;;  %s641_s0 = inlined_call_operand.vmem [shape: f32[8,1], index: 0, kind: input, shape index: {}]   ;;  %s642_s1 = inlined_call_operand.vmem [shape: f32[8,1], index: 1, kind: input, shape index: {}]   ;;  %s643_s2 = inlined_call_operand.vmem [shape: f32[8,256], index: 2, kind: input, shape index: {}]   ;;  %s644_s3 = inlined_call_operand.hbm [shape: f32[8,256], index: 3, kind: output, shape index: {}]  }
   0x1   :  { %10 = vsyncpa [#allocation3 + $0x1], 0  ;;  %s538_s12 = smov 0   ;;  %s540_s13 = smov 0  }
   0x2   :  { %s542_s14 = smov 0   ;;  %s544_s15 = smov 0  }
   0x3   :  { %s546_s16 = smov 0   ;;  %s548_s17 = smov 0  }
   0x4 LB: > { %s367_s18 = sadd.s32 4294967295, %s515_s17   ;;  %s368_s19 = sadd.s32 4294967294, %s515_s17   ;;  %s515_s17 = sphi %s548_s17, %s16_s17   ;;  %s511_s16 = sphi %s546_s16, %s651_s16   ;;  %s507_s15 = sphi %s544_s15, %s650_s15   ;;  %s503_s14 = sphi %s542_s14, %s649_s14   ;;  %s499_s13 = sphi %s540_s13, %s648_s13   ;;  %s495_s12 = sphi %s538_s12, %s647_s12  }
   0x5   : > { %s25_s20 = sadd.s32 1, %s511_s16  ;;  %s117_s21 = sadd.s32 1, %s503_s14 }
   0x6   : > { %p26_p0 = scmp.ge.s32.totalorder %s25_s20, 2  ;;  %p127_p1 = scmp.ne.s32.totalorder %s503_s14, %s499_s13 }
   0x7   : > { %p128_p2 = scmp.eq.s32.totalorder %s367_s18, 1  ;;  %p133_p3 = scmp.ne.s32.totalorder %s499_s13, %s495_s12 }
   0x8   : > { %s653_s20 = smov (%p26_p0, %s25_s20), 0  ;;  %p134_p5 = scmp.eq.s32.totalorder %s368_s19, 1 }
   0x9   : > { %p578_p4 = por %p128_p2, %p127_p1  ;;  %s113_s23 = ssub.s32 %s511_s16, %s653_s20 }
   0xa   : > { %p373_p6 = scmp.ge.s32.totalorder %s515_s17, 1  ;;  %p115_p7 = scmp.eq.s32.totalorder %s113_s23, 0 }
   0xb   : > { %p585_p8 = por %p134_p5, %p133_p3  ;;  %p177_p9 = scmp.lt.s32.totalorder %s515_s17, 3 }
   0xc   : > { %s591_s25 = scalar_select %p115_p7, %s503_s14, %s117_s21  }
   0xd   : > { %p178_p10 = pnand %p373_p6, %p177_p9 }
   0xe   : > { %p222_p11 = scmp.lt.s32.totalorder (!%p178_p10), %s507_s15, 1  ;;  %s209_s4 = sand.u32 (!%p178_p10), 1, %s499_s13  }
   0xf   : > { %181 = sbr.rel (%p178_p10) target bundleno = 150 (0x96), region = 32  ;;  %s374_s6 = sshll.u32 (!%p178_p10), %s209_s4, 3 }
  0x10   : > { %s377_s7 = sshll.u32 (!%p178_p10), %s507_s15, 3  ;;  %s211_s21 = scalar_lea.vmem (!%p178_p10), [#allocation2], %s374_s6 }
  0x11   : > { %s257_s19 = scalar_lea.hbm (!%p178_p10), %s644_s3, %s377_s7  ;;  %s259_s23 = sshll.u32 (!%p178_p10), %s211_s21, 4  ;;  %s260_s23 = int_to_ptr.vmem [resolvable:$true] %s259_s23 }
  0x12   : > { %s261_s26 = sshll.u32 (!%p178_p10), %s257_s19, 4  ;;  %s262_s26 = int_to_ptr.hbm [resolvable:$true] %s261_s26 }
  0x13   : > { %s451_s27 = sshra.s32 (!%p178_p10), %s262_s26, 4  ;;  %s452_s27 = int_to_ptr.hbm [resolvable:$true] %s451_s27 }
  0x14   : > { %v229_v0 = vld [vmem:[%s641_s0] sm:$0xff]  ;;  %v517_v1 = vmov 0   ;;  %s223_s30 = scalar_select %p222_p11, %s507_s15, 1 }
  0x15   : > { %436 = vset.pattern.permute.xlu0 %v517_v1  ;;  %v236_v2 = vld [vmem:[%s642_s1] sm:$0xff]  ;;  %s245_s15 = scalar_lea.sflag [#allocation3], %s209_s4  ;;  %s453_s28 = scalar_lea.hbm %s452_s27, 8 }
  0x16   : > { %232 = vperm.xlu0 %436, %v229_v0   ;;  %s375_s5 = sshll.u32 %s223_s30, 3  ;;  %p454_p12 = scmp.ne.s32.totalorder %s452_s27, %s453_s28 }
  0x17   : > { %s227_s10 = scalar_lea.vmem %s643_s2, %s375_s5  ;;  %s457_s5 = scalar_lea.hbm %s644_s3, 16 }
  0x18   : > { %v228_v4 = vld [vmem:[%s227_s10] sm:$0xff]  ;;  %p455_p13 = pnand %p454_p12, %p578_p4  ;;  %p458_p1 = scmp.lt.s32.totalorder %s452_s27, %s644_s3 }
  0x19   : > { %p459_p2 = scmp.lt.s32.totalorder %s457_s5, %s453_s28 }
  0x1a   : > { %p456_p0 = pneg %p455_p13 }
  0x1b   : > { %p460_p3 = por %p459_p2, %p458_p1 }
  0x1d   : > { %p461_p5 = pnand %p460_p3, %p456_p0 }
  0x1e   : > { %239 = vperm.xlu0 %436, %v236_v2  }
  0x88   : > { %v233_v3 = vpop.permute.xlu0 %232 }
  0x89   : > { %v235_v5 = vmul.f32 %v233_v3, %v228_v4 }
  0x90   : > { %v240_v6 = vpop.permute.xlu0 %239 }
  0x91   : > { %v242_v7 = vadd.f32 %v240_v6, %v235_v5 }
  0x93   : > { %243 = vst [vmem:[%s211_s21] sm:$0xff] %v242_v7 }
  0x94   : > { %464 = shalt.err (!%p461_p5)
}
  0x95   : > { %380 = dma.vmem_to_hbm [thread:$0]  (%p578_p4), %s260_s23, 128, %s262_s26, %s245_s15  }
  0x96 PF: > { %p386_p6 = scmp.ge.s32.totalorder %s515_s17, 2  ;;  %s273_s4 = sand.u32 1, %s495_s12  }
  0x97   : > { %s274_s8 = scalar_lea.sflag [#allocation3], %s273_s4 }
  0x98   : > { %p383_p7 = pnand %p386_p6, %p585_p8 }
  0x9a   : > { %p384_p9 = pneg %p383_p7 }
  0x9c   : > { %490 = dma.done.wait (%p384_p9), %s274_s8, 128  }
  0x9d   : > { %492 = vsyncadd (%p384_p9), %s274_s8, 4294967168  ;;  %s16_s17 = sadd.s32 1, %s515_s17   ;;  %s647_s12 = smov %s499_s13 }
  0x9e   : > { %p13_p10 = scmp.ge.s32.totalorder %s16_s17, 4   ;;  %s648_s13 = smov %s503_s14 }
  0x9f   : > { %s649_s14 = smov %s591_s25  ;;  %s650_s15 = smov %s511_s16 }
  0xa0   : > { %s651_s16 = smov %s653_s20  ;;  %15 = sbr.rel (!%p13_p10) target bundleno = 4 (0x4), region = 73 }
  0xa5   :  { %280 = vsyncpa [#allocation3], 1 }
  0xa6   :  { %282 = vsyncpa [#allocation3 + $0x1], 1 }

</bundles_post_ra>
